<compile_context>
chip_gen: v5e
topology: v5e:2x2
jax: 0.10.0
libtpu: 0.0.40
codegen_flags: <defaults>
</compile_context>

<pallas_src>
import numpy as np

import jax
import jax.numpy as jnp
from jax.experimental import pallas as pl
from jax.experimental.pallas import tpu as pltpu


def _hbm_copy_kernel(x_ref, o_ref, sem):
    # Whole-array HBM->HBM DMA: issue once, wait once.  No VMEM round trip.
    copy = pltpu.make_async_copy(x_ref, o_ref, sem)
    copy.start()
    copy.wait()


def _materialized_copy(x):
    """Single-DMA materializing copy of `x` into a fresh buffer."""
    return pl.pallas_call(
        _hbm_copy_kernel,
        out_shape=jax.ShapeDtypeStruct(x.shape, x.dtype),
        in_specs=[pl.BlockSpec(memory_space=pl.ANY)],
        out_specs=pl.BlockSpec(memory_space=pl.ANY),
        scratch_shapes=[pltpu.SemaphoreType.DMA(())],
    )(x)


def fixed_mesh_1d_forward(x_comp, loss_type="mesh_loss", materialize=False):
    """Pallas equivalent of Fixed_Mesh_1D.forward.

    x_comp: array of fixed 1-D mesh point coordinates (e.g. shape (N, 1)).
    Returns x_comp (pass-through) for 'mesh_loss', None for 'pde_loss'.
    Set materialize=True only if the caller needs a decoupled output buffer;
    the copy is then done with one HBM->HBM DMA (no VMEM staging).
    """
    if loss_type == "pde_loss":
        # TODO(synk): PyTorch forward falls through (returns None) for
        # 'pde_loss'; kept as Python None — jitted callers must use the
        # mesh_loss branch.
        return None
    if loss_type != "mesh_loss":
        raise ValueError(f"unknown loss_type: {loss_type}")

    if not materialize:
        # The forward is an identity: the cheapest correct implementation is
        # to not touch HBM at all.
        return x_comp

    return _materialized_copy(x_comp)


if __name__ == "__main__":
    key = jax.random.PRNGKey(0)
    k1, k2, k3 = jax.random.split(key, 3)

    # --- Module config from the spec: opt['mesh_dims'][0] meshpoints. -------
    opt = {"mesh_dims": [8], "loss_type": "mesh_loss"}
    n_small = opt["mesh_dims"][0]
    base_s = jnp.linspace(0.0, 1.0, n_small, dtype=jnp.float32)[:, None]
    x_small = base_s + 0.01 * jax.random.normal(k1, (n_small, 1), jnp.float32)

    # Default pass-through path (no kernel launch — the only path that
    # matters for perf).
    out_small = fixed_mesh_1d_forward(x_small, loss_type=opt["loss_type"])
    out_small = jax.block_until_ready(out_small)
    assert out_small.shape == x_small.shape and out_small.dtype == x_small.dtype
    assert bool(jnp.allclose(out_small, x_small))

    # pde_loss branch returns None, matching the PyTorch module.
    assert fixed_mesh_1d_forward(x_small, loss_type="pde_loss") is None

    # --- Pallas HBM->HBM copy path (materialize=True), small mesh. ----------
    out_small_mat = fixed_mesh_1d_forward(x_small, loss_type="mesh_loss",
                                          materialize=True)
    out_small_mat = jax.block_until_ready(out_small_mat)
    assert out_small_mat.shape == x_small.shape
    assert out_small_mat.dtype == x_small.dtype
    assert np.allclose(np.asarray(out_small_mat), np.asarray(x_small))

    # --- Larger mesh through the same single-DMA copy. -----------------------
    n_big = 4096
    base_b = jnp.linspace(0.0, 1.0, n_big, dtype=jnp.float32)[:, None]
    x_big = base_b + 0.01 * jax.random.normal(k2, (n_big, 1), jnp.float32)
    expected_big = np.asarray(x_big)

    out_big = fixed_mesh_1d_forward(x_big, loss_type="mesh_loss",
                                    materialize=True)
    out_big = jax.block_until_ready(out_big)
    assert out_big.shape == x_big.shape and out_big.dtype == x_big.dtype
    assert np.allclose(np.asarray(out_big), expected_big)

    # --- Ragged size (not a multiple of 128): no pad/slice needed — the DMA
    # copies the whole ref regardless of shape. -------------------------------
    n_odd = 1500
    base_o = jnp.linspace(0.0, 1.0, n_odd, dtype=jnp.float32)[:, None]
    x_odd = base_o + 0.01 * jax.random.normal(k3, (n_odd, 1), jnp.float32)
    expected_odd = np.asarray(x_odd)

    out_odd = fixed_mesh_1d_forward(x_odd, loss_type="mesh_loss",
                                    materialize=True)
    out_odd = jax.block_until_ready(out_odd)
    assert out_odd.shape == x_odd.shape
    assert np.allclose(np.asarray(out_odd), expected_odd)

    # --- Non-f32 dtype: no sublane/tile rules apply on the DMA path. ---------
    x_bf16 = x_big.astype(jnp.bfloat16)
    out_bf16 = fixed_mesh_1d_forward(x_bf16, loss_type="mesh_loss",
                                     materialize=True)
    out_bf16 = jax.block_until_ready(out_bf16)
    assert out_bf16.dtype == jnp.bfloat16
    assert np.array_equal(np.asarray(out_bf16), np.asarray(x_bf16))

    print("KERNEL_OK")
</pallas_src>

<mosaic_0001>
module attributes {stable_mosaic.version = 11 : i64} {
  func.func @_hbm_copy_kernel(%arg0: memref<8x1xf32, #tpu.memory_space<any>>, %arg1: memref<8x1xf32, #tpu.memory_space<any>>, %arg2: memref<!tpu.dma_semaphore, #tpu.memory_space<semaphore_mem>>) attributes {dimension_semantics = [], scalar_prefetch = 0 : i64, scratch_operands = 1 : i64, tpu.core_type = #tpu.core_type<tc>} {
    tpu.enqueue_dma source(%arg0 : memref<8x1xf32, #tpu.memory_space<any>>) target(%arg1 : memref<8x1xf32, #tpu.memory_space<any>>) target_semaphore(%arg2 : memref<!tpu.dma_semaphore, #tpu.memory_space<semaphore_mem>>)
    tpu.wait_dma2 semaphore(%arg2 : memref<!tpu.dma_semaphore, #tpu.memory_space<semaphore_mem>>) src(%arg0 : memref<8x1xf32, #tpu.memory_space<any>>) dst(%arg1 : memref<8x1xf32, #tpu.memory_space<any>>)
    return
  }
}

</mosaic_0001>

<bundles_post_ra>
// kernel: tpu_custom_call.1
= control target key start
LH: loop header
LB: loop body
LE: loop exit
PB: predicated region body
PF: predicated region fallthrough
CT: control target
= control target key end

     0   :  { %s72_s0 = inlined_call_operand.vmem [shape: f32[8,1], index: 0, kind: input, shape index: {}]   ;;  %s73_s1 = inlined_call_operand.vmem [shape: f32[8,1], index: 1, kind: output, shape index: {}]  }
   0x1   :  { %v32_v0 = vld [vmem:[%s72_s0] sm:$0xff] }
   0x2   :  { %33 = vst [vmem:[%s73_s1] sm:$0xff] %v32_v0 }
   0x3   :  { %39 = vsyncadd [#allocation2], 128 }
   0x4   :  { %54 = dma.done.wait [#allocation2], 128 }
   0x5   :  { %55 = vsyncadd [#allocation2], 4294967168 }
   0x6   :  { %43 = vsyncmov [#allocation2] }
   0x9   :  { %s44_s10 = vpop.sfrf %43 }
   0xa   :  { %p53_p0 = scmp.ne.s32.totalorder %s44_s10, 0 }
   0xc   :  { %48 = shalt.err (%p53_p0)  }

</bundles_post_ra>
